<compile_context>
chip_gen: v7x
topology: tpu7x:2x2x1
jax: 0.10.0
libtpu: 0.0.40
codegen_flags: <defaults>
</compile_context>

<pallas_src>
import functools
import math

import jax
import jax.numpy as jnp
from jax.experimental import pallas as pl
from jax.experimental.pallas import tpu as pltpu


def _round_up(x: int, m: int) -> int:
    return (x + m - 1) // m * m


def _move_embedding_kernel(idx_ref, table_ref, out_ref):
    # idx_ref:   (TILE, 1) int32 tile of token ids
    # table_ref: (V, D)    embedding table (f32 or bf16), resident in VMEM
    # out_ref:   (TILE, D) gathered embeddings
    idx = idx_ref[...]                                   # (TILE, 1)
    tile = out_ref.shape[0]
    v = table_ref.shape[0]
    # one_hot[t, j] = (idx[t] == j); exact gather for 0/1 weights.
    col = jax.lax.broadcasted_iota(jnp.int32, (tile, v), dimension=1)
    one_hot = (idx == col).astype(table_ref.dtype)       # (TILE, V)
    out_ref[...] = jnp.dot(
        one_hot, table_ref[...], preferred_element_type=jnp.float32
    ).astype(out_ref.dtype)


@functools.partial(jax.jit, static_argnames=("token_tile",))
def move_embedding_forward(x, table, *, token_tile=256):
    """Pallas equivalent of MoveEmbedding.forward.

    x:     integer indices, arbitrary leading shape (e.g. (B, S))
    table: (V, D) embedding table (float32 or bfloat16)
    returns table.dtype array of shape x.shape + (D,)
    """
    v, d = table.shape
    lead_shape = x.shape
    n = math.prod(lead_shape) if lead_shape else 1

    # Token tile: default 256 (MXU-filling), clamped to the problem size so a
    # handful of tokens is not padded out to 256; always a multiple of 8.
    tile = _round_up(min(token_tile, _round_up(n, 8)), 8)
    n_pad = _round_up(n, tile)

    idx_flat = x.reshape(n).astype(jnp.int32)
    if n_pad != n:
        idx_flat = jnp.pad(idx_flat, (0, n_pad - n))      # pad tokens gather row 0
    idx_flat = idx_flat.reshape(n_pad, 1)

    grid = (n_pad // tile,)

    # Size the scoped-VMEM limit from the real footprint (table is
    # double-buffered by the pipeline, plus in/out tiles and the one-hot
    # intermediate).  Default scoped limit is only 16 MiB on v5e / 32 MiB on
    # v6e & v7x.
    itemsize = jnp.dtype(table.dtype).itemsize
    table_bytes = v * d * itemsize
    out_tile_bytes = tile * d * itemsize
    one_hot_bytes = tile * _round_up(v, 128) * 4
    vmem_need = (2 * table_bytes + 2 * out_tile_bytes + 2 * tile * 4
                 + one_hot_bytes + (2 << 20))
    vmem_limit = min(max(vmem_need, 32 * 1024 * 1024), 100 * 1024 * 1024)

    out = pl.pallas_call(
        _move_embedding_kernel,
        out_shape=jax.ShapeDtypeStruct((n_pad, d), table.dtype),
        grid_spec=pltpu.PrefetchScalarGridSpec(
            num_scalar_prefetch=0,
            grid=grid,
            in_specs=[
                # (TILE, 1) id tile: ~1 KiB/step, fully hidden by pipelining.
                pl.BlockSpec((tile, 1), lambda i: (i, 0)),
                # Full table, block index never changes -> DMA'd once.
                pl.BlockSpec((v, d), lambda i: (0, 0)),
            ],
            out_specs=pl.BlockSpec((tile, d), lambda i: (i, 0)),
        ),
        compiler_params=pltpu.CompilerParams(
            dimension_semantics=("parallel",),   # shards grid across v7x's 2 TCs
            vmem_limit_bytes=int(vmem_limit),
        ),
    )(idx_flat, table)

    if n_pad != n:
        out = out[:n]
    return out.reshape(*lead_shape, d)


if __name__ == "__main__":
    # Deterministic synthetic "movedex" embedding table (no .pt loading).
    key = jax.random.PRNGKey(0)
    k_tab, k_idx1, k_idx2 = jax.random.split(key, 3)

    num_embeddings = 256     # V (synthetic movedex size)
    embedding_dim = 128      # D (lane-aligned)

    table = jax.random.normal(
        k_tab, (num_embeddings, embedding_dim), dtype=jnp.float32)

    # Small case, matching typical module usage (a few move slots).
    x_small = jax.random.randint(
        k_idx1, (2, 8), 0, num_embeddings, dtype=jnp.int32)
    out_small = jax.block_until_ready(move_embedding_forward(x_small, table))
    assert out_small.shape == (2, 8, embedding_dim)
    assert out_small.dtype == jnp.float32
    assert jnp.allclose(out_small, table[x_small]), "small case mismatch"

    # Larger case exercising the 256-token tile and a multi-step parallel grid
    # (2048 tokens -> 8 grid steps).
    x_big = jax.random.randint(
        k_idx2, (4, 512), 0, num_embeddings, dtype=jnp.int32)
    out_big = jax.block_until_ready(move_embedding_forward(x_big, table))
    assert out_big.shape == (4, 512, embedding_dim)
    assert jnp.allclose(out_big, table[x_big]), "large case mismatch"

    print("KERNEL_OK")
</pallas_src>

<mosaic_0001>
module attributes {stable_mosaic.version = 11 : i64} {
  func.func @_move_embedding_kernel(%arg0: i32, %arg1: memref<16x1xi32, #tpu.memory_space<vmem>>, %arg2: memref<256x128xf32, #tpu.memory_space<vmem>>, %arg3: memref<16x128xf32, #tpu.memory_space<vmem>>) attributes {dimension_semantics = [#tpu.dimension_semantics<parallel>], iteration_bounds = array<i64: 1>, scalar_prefetch = 0 : i64, scratch_operands = 0 : i64, tpu.core_type = #tpu.core_type<tc>, window_params = [{transform_indices = @transform_0, window_bounds = array<i64: 16, 1>}, {pipeline_mode = #tpu.pipeline_mode<synchronous>, transform_indices = @transform_1, window_bounds = array<i64: 256, 128>}, {transform_indices = @transform_2, window_bounds = array<i64: 16, 128>}]} {
    %c0 = arith.constant 0 : index
    %c0_0 = arith.constant 0 : index
    %0 = vector.load %arg1[%c0, %c0_0] : memref<16x1xi32, #tpu.memory_space<vmem>>, vector<16x1xi32>
    %1 = tpu.iota {dimensions = array<i32: 1>} : vector<16x256xi32>
    %2 = vector.broadcast %0 : vector<16x1xi32> to vector<16x256xi32>
    %3 = arith.cmpi eq, %2, %1 : vector<16x256xi32>
    %4 = arith.extui %3 : vector<16x256xi1> to vector<16x256xi32>
    %5 = arith.sitofp %4 : vector<16x256xi32> to vector<16x256xf32>
    %c0_1 = arith.constant 0 : index
    %c0_2 = arith.constant 0 : index
    %6 = vector.load %arg2[%c0_1, %c0_2] : memref<256x128xf32, #tpu.memory_space<vmem>>, vector<256x128xf32>
    %cst = arith.constant dense<0.000000e+00> : vector<16x128xf32>
    %7 = tpu.matmul %5, %6, %cst {dimension_numbers = #tpu.dot_dimension_numbers<[1], [0], [0], [1], [0, 0, 1, 1], [], []>} : vector<16x256xf32>, vector<256x128xf32>, vector<16x128xf32> -> vector<16x128xf32>
    %c0_3 = arith.constant 0 : index
    %c0_4 = arith.constant 0 : index
    %8 = vector.load %arg3[%c0_3, %c0_4] : memref<16x128xf32, #tpu.memory_space<vmem>>, vector<16x128xf32>
    tpu.vector_store %arg3[%c0_3, %c0_4], %7 {strides = array<i32>} : memref<16x128xf32, #tpu.memory_space<vmem>>, vector<16x128xf32>,
    return
  }
  func.func @transform_0(%arg0: i32) -> (i32, i32) {
    %c0_i32 = arith.constant 0 : i32
    %c0_i32_0 = arith.constant 0 : i32
    return %arg0, %c0_i32 : i32, i32
  }
  func.func @transform_1(%arg0: i32) -> (i32, i32) {
    %c0_i32 = arith.constant 0 : i32
    %c0_i32_0 = arith.constant 0 : i32
    %c0_i32_1 = arith.constant 0 : i32
    return %c0_i32, %c0_i32_0 : i32, i32
  }
  func.func @transform_2(%arg0: i32) -> (i32, i32) {
    %c0_i32 = arith.constant 0 : i32
    %c0_i32_0 = arith.constant 0 : i32
    return %arg0, %c0_i32 : i32, i32
  }
}

</mosaic_0001>

<bundles_post_ra>
// kernel: move_embedding_forward.1
= control target key start
LH: loop header
LB: loop body
LE: loop exit
PB: predicated region body
PF: predicated region fallthrough
CT: control target
= control target key end

     0   :  { %7 = vsyncpa [#allocation3], 0  ;;  %s381_s0 = inlined_call_operand.vmem [shape: s32[16,1], index: 0, kind: input, shape index: {}]   ;;  %s382_s1 = inlined_call_operand.hbm [shape: f32[256,128], index: 1, kind: input, shape index: {}]   ;;  %s383_s2 = inlined_call_operand.hbm [shape: f32[16,128], index: 2, kind: output, shape index: {}]  }
   0x1   :  { %8 = vsyncpa [#allocation4], 0  ;;  %s324_s9 = smov [#allocation2]   ;;  %s276_s13 = scalar_lea.hbm %s382_s1, 4096 }
   0x2   :  { %s16_s10 = sshll.u32 %s324_s9, 4  ;;  %p277_p0 = scmp.ne.s32.totalorder %s382_s1, %s276_s13  ;;  %s17_s10 = int_to_ptr.vmem [resolvable:$true] %s16_s10 }
   0x3   :  { %p280_p1 = scmp.lt.u32.totalorder %s276_s13, %s382_s1 }
   0x5   :  { %p282_p2 = pnand %p280_p1, %p277_p0 }
   0x7   :  { %285 = shalt.err (!%p282_p2)
}
   0x8   :  { %s286_s18 = scalar_lea.vmem %s17_s10, 4096  ;;  %p291_p4 = scmp.lt.s32.totalorder %s17_s10, %s17_s10 }
   0x9   :  { %p287_p3 = scmp.ne.s32.totalorder %s17_s10, %s286_s18  ;;  %p292_p5 = scmp.lt.s32.totalorder %s286_s18, %s286_s18 }
   0xb   :  { %p293_p6 = por %p292_p5, %p291_p4 }
   0xd   :  { %p294_p7 = pnand %p293_p6, %p287_p3 }
   0xf   :  { %297 = shalt.err (!%p294_p7)
}
  0x10   :  { %s325_s19 = smov 128   ;;  %s326_s20 = smov 8  }
  0x11   :  { %22 = dma.hbm_to_vmem [thread:$0]  %s382_s1, 4096, %s17_s10, [#allocation3], %s325_s19, %s325_s19, %s326_s20  }
  0x12   :  { %320 = dma.done.wait [#allocation3], 4096  }
  0x13   :  { %321 = vsyncadd [#allocation3], 4294963200  ;;  %v327_v0 = vmov 0   ;;  %v26_v1 = vld [vmem:[%s381_s0] sm:$0xff]  ;;  %v27_v2 = vld [vmem:[%s381_s0 + $0x8] sm:$0xff]  ;;  %v28_v51 = vlaneseq  ;;  %v328_v55 = vmov 1.0  }
  0x14   :  { %275 = vset.pattern.permute.xlu0 %v327_v0  ;;  %v65_v3 = vld [vmem:[#allocation2 + $0x80] sm:$0xff]  ;;  %v66_v4 = vld [vmem:[#allocation2 + $0x88] sm:$0xff]  ;;  %v67_v9 = vld [vmem:[#allocation2 + $0x90] sm:$0xff]  ;;  %s329_s0 = smov [#allocation5]  }
  0x15   :  { %32 = vperm.xlu0 %275, %v26_v1   ;;  %v49_v5 = vld [vmem:[#allocation2] sm:$0xff]  ;;  %v50_v6 = vld [vmem:[#allocation2 + $0x8] sm:$0xff]  ;;  %v221_v7 = vpack.c.bf16 %v66_v4, %v65_v3  ;;  %v68_v10 = vld [vmem:[#allocation2 + $0x98] sm:$0xff]  ;;  %v29_v52 = vand.u32 127, %v28_v51  ;;  %s163_s1 = sshll.u32 %s329_s0, 4  ;;  %s164_s1 = int_to_ptr.vmem [resolvable:$true] %s163_s1 }
  0x16   :  { %v223_v8 = vpack.c.bf16 %v50_v6, %v49_v5  ;;  %v51_v11 = vld [vmem:[#allocation2 + $0x10] sm:$0xff]  ;;  %v225_v12 = vpack.c.bf16 %v68_v10, %v67_v9  ;;  %v52_v13 = vld [vmem:[#allocation2 + $0x18] sm:$0xff]  ;;  %v69_v14 = vld [vmem:[#allocation2 + $0xa0] sm:$0xff]  ;;  %s298_s27 = scalar_lea.vmem %s164_s1, 256  ;;  %p303_p9 = scmp.lt.s32.totalorder %s164_s1, %s164_s1 }
  0x17   :  { %v70_v15 = vld [vmem:[#allocation2 + $0xa8] sm:$0xff]  ;;  %222 = vmatprep.subr.bf16.mxu0 %v221_v7  ;;  %253 = vmatprep.subr.bf16.mxu1 %v221_v7  ;;  %v227_v16 = vpack.c.bf16 %v52_v13, %v51_v11  ;;  %v53_v18 = vld [vmem:[#allocation2 + $0x20] sm:$0xff]  ;;  %v71_v20 = vld [vmem:[#allocation2 + $0xb0] sm:$0xff]  ;;  %v30_v53 = vadd.s32 128, %v29_v52  ;;  %p299_p8 = scmp.ne.s32.totalorder %s164_s1, %s298_s27  ;;  %p304_p10 = scmp.lt.s32.totalorder %s298_s27, %s298_s27 }
  0x18   :  { %224 = vmatpush3.bf16.msra.mxu0 %v223_v8  ;;  %261 = vmatpush3.bf16.msra.mxu1 %v223_v8  ;;  %v229_v17 = vpack.c.bf16 %v70_v15, %v69_v14  ;;  %v54_v19 = vld [vmem:[#allocation2 + $0x28] sm:$0xff]  ;;  %v72_v21 = vld [vmem:[#allocation2 + $0xb8] sm:$0xff]  ;;  %v55_v24 = vld [vmem:[#allocation2 + $0x30] sm:$0xff] }
  0x19   :  { %35 = vperm.xlu0 %275, %v27_v2   ;;  %226 = vmatprep.subr.bf16.mxu0 %v225_v12  ;;  %v231_v22 = vpack.c.bf16 %v54_v19, %v53_v18  ;;  %v233_v23 = vpack.c.bf16 %v72_v21, %v71_v20  ;;  %v56_v25 = vld [vmem:[#allocation2 + $0x38] sm:$0xff]  ;;  %v73_v26 = vld [vmem:[#allocation2 + $0xc0] sm:$0xff]  ;;  %v74_v27 = vld [vmem:[#allocation2 + $0xc8] sm:$0xff]  ;;  %p305_p11 = por %p304_p10, %p303_p9 }
  0x1a   :  { %254 = vmatprep.subr.bf16.mxu1 %v225_v12  ;;  %v235_v28 = vpack.c.bf16 %v56_v25, %v55_v24  ;;  %v237_v29 = vpack.c.bf16 %v74_v27, %v73_v26  ;;  %v57_v30 = vld [vmem:[#allocation2 + $0x40] sm:$0xff]  ;;  %v58_v31 = vld [vmem:[#allocation2 + $0x48] sm:$0xff]  ;;  %v75_v32 = vld [vmem:[#allocation2 + $0xd0] sm:$0xff] }
  0x1b   :  { %v76_v33 = vld [vmem:[#allocation2 + $0xd8] sm:$0xff]  ;;  %v239_v34 = vpack.c.bf16 %v58_v31, %v57_v30  ;;  %v59_v36 = vld [vmem:[#allocation2 + $0x50] sm:$0xff]  ;;  %v77_v38 = vld [vmem:[#allocation2 + $0xe0] sm:$0xff]  ;;  %p306_p12 = pnand %p305_p11, %p299_p8 }
  0x1c   :  { %228 = vmatpush3.bf16.msra.mxu0 %v227_v16  ;;  %262 = vmatpush3.bf16.msra.mxu1 %v227_v16  ;;  %v241_v35 = vpack.c.bf16 %v76_v33, %v75_v32  ;;  %v60_v37 = vld [vmem:[#allocation2 + $0x58] sm:$0xff]  ;;  %v78_v39 = vld [vmem:[#allocation2 + $0xe8] sm:$0xff]  ;;  %v61_v42 = vld [vmem:[#allocation2 + $0x60] sm:$0xff] }
  0x1d   :  { %230 = vmatprep.subr.bf16.mxu0 %v229_v17  ;;  %255 = vmatprep.subr.bf16.mxu1 %v229_v17  ;;  %v243_v40 = vpack.c.bf16 %v60_v37, %v59_v36  ;;  %v245_v41 = vpack.c.bf16 %v78_v39, %v77_v38  ;;  %v62_v43 = vld [vmem:[#allocation2 + $0x68] sm:$0xff]  ;;  %v79_v44 = vld [vmem:[#allocation2 + $0xf0] sm:$0xff]  ;;  %v80_v45 = vld [vmem:[#allocation2 + $0xf8] sm:$0xff] }
  0x1e   :  { %v247_v46 = vpack.c.bf16 %v62_v43, %v61_v42  ;;  %v249_v47 = vpack.c.bf16 %v80_v45, %v79_v44  ;;  %v63_v48 = vld [vmem:[#allocation2 + $0x70] sm:$0xff]  ;;  %v64_v49 = vld [vmem:[#allocation2 + $0x78] sm:$0xff] }
  0x1f   :  { %v251_v50 = vpack.c.bf16 %v64_v49, %v63_v48 }
  0x20   :  { %232 = vmatpush3.bf16.msra.mxu0 %v231_v22  ;;  %263 = vmatpush3.bf16.msra.mxu1 %v231_v22 }
  0x21   :  { %234 = vmatprep.subr.bf16.mxu0 %v233_v23  ;;  %256 = vmatprep.subr.bf16.mxu1 %v233_v23 }
  0x24   :  { %236 = vmatpush3.bf16.msra.mxu0 %v235_v28  ;;  %264 = vmatpush3.bf16.msra.mxu1 %v235_v28 }
  0x25   :  { %238 = vmatprep.subr.bf16.mxu0 %v237_v29  ;;  %257 = vmatprep.subr.bf16.mxu1 %v237_v29 }
  0x28   :  { %240 = vmatpush3.bf16.msra.mxu0 %v239_v34  ;;  %265 = vmatpush3.bf16.msra.mxu1 %v239_v34 }
  0x29   :  { %242 = vmatprep.subr.bf16.mxu0 %v241_v35  ;;  %258 = vmatprep.subr.bf16.mxu1 %v241_v35 }
  0x2c   :  { %244 = vmatpush3.bf16.msra.mxu0 %v243_v40  ;;  %266 = vmatpush3.bf16.msra.mxu1 %v243_v40 }
  0x2d   :  { %246 = vmatprep.subr.bf16.mxu0 %v245_v41  ;;  %259 = vmatprep.subr.bf16.mxu1 %v245_v41 }
  0x30   :  { %248 = vmatpush3.bf16.msra.mxu0 %v247_v46  ;;  %267 = vmatpush3.bf16.msra.mxu1 %v247_v46 }
  0x31   :  { %250 = vmatprep.subr.bf16.mxu0 %v249_v47  ;;  %260 = vmatprep.subr.bf16.mxu1 %v249_v47 }
  0x34   :  { %252 = vmatpush3.bf16.msra.mxu0 %v251_v50  ;;  %268 = vmatpush3.bf16.msra.mxu1 %v251_v50 }
  0x94   :  { %v33_v54 = vpop.permute.xlu0 %32 }
  0x95   :  { %vm37_vm0 = vcmp.eq.s32.totalorder %v33_v54, %v29_v52  ;;  %vm38_vm1 = vcmp.eq.s32.totalorder %v33_v54, %v30_v53 }
  0x96   :  { %179 = vmatprep.mubr.msk.f32.mxu0 %vm38_vm1, %v328_v55 }
  0x97   :  { %180 = vmatmul.mubr.msk.f32.vlgmr.msra.gmra.mrb[0].mxu0 %vm37_vm0, %v328_v55 }
  0x98   :  { %v36_v56 = vpop.permute.xlu0 %35 }
  0x99   :  { %vm39_vm2 = vcmp.eq.s32.totalorder %v36_v56, %v29_v52  ;;  %vm40_vm3 = vcmp.eq.s32.totalorder %v36_v56, %v30_v53 }
  0x9a   :  { %181 = vmatprep.mubr.msk.f32.mxu1 %vm40_vm3, %v328_v55 }
  0x9b   :  { %182 = vmatmul.mubr.msk.f32.vlgmr.msra.gmra.mrb[0].mxu1 %vm39_vm2, %v328_v55 }
 0x16a   :  { %v215_v57 = vpop.f32.mrb[0].mxu0 }
 0x16b   :  { %v216_v58 = vpop.f32.mrb[1].mxu0 }
 0x16c   :  { %v217_v59 = vadd.f32 %v216_v58, %v215_v57 }
 0x16e   :  { %156 = vst [vmem:[#allocation5] sm:$0xff] %v217_v59  ;;  %v218_v60 = vpop.f32.mrb[0].mxu1 }
 0x16f   :  { %v219_v61 = vpop.f32.mrb[1].mxu1 }
 0x170   :  { %v220_v62 = vadd.f32 %v219_v61, %v218_v60 }
 0x172   :  { %157 = vst [vmem:[#allocation5 + $0x8] sm:$0xff] %v220_v62 }
 0x173   :  { %309 = shalt.err (!%p306_p12)
}
 0x174   :  { %s310_s30 = scalar_lea.hbm %s383_s2, 256 }
 0x175   :  { %p311_p13 = scmp.ne.s32.totalorder %s383_s2, %s310_s30  ;;  %p314_p0 = scmp.lt.u32.totalorder %s310_s30, %s383_s2 }
 0x177   :  { %p316_p1 = pnand %p314_p0, %p311_p13 }
 0x179   :  { %319 = shalt.err (!%p316_p1)
}
 0x17a   :  { %169 = dma.vmem_to_hbm [thread:$0]  %s164_s1, 256, %s383_s2, [#allocation4], %s325_s19, %s325_s19, %s326_s20  }
 0x17b   :  { %322 = dma.done.wait [#allocation4], 256  }
 0x17c   :  { %323 = vsyncadd [#allocation4], 4294967040 }
 0x17d   :  { %173 = vsyncpa [#allocation3], 1 }
 0x17e   :  { %174 = vsyncpa [#allocation4], 1 }

</bundles_post_ra>
